<compile_context>
chip_gen: v6e
topology: v6e:2x2x1
jax: 0.10.0
libtpu: 0.0.40
codegen_flags: <defaults>
</compile_context>

<pallas_src>
import jax
import jax.numpy as jnp
from jax.experimental import pallas as pl
from jax.experimental.pallas import tpu as pltpu

N = 8            # number of nodes
NFEAT = 32       # input feature dim
H1, C1 = 8, 16   # conv1: heads=8, out_channels=16  -> concat width 128
HC = H1 * C1     # 128
NCLASS = 4       # conv2: heads=1, out_channels=nclass, concat=False
NEG_SLOPE = 0.2  # PyG GATConv default negative_slope
MASK_VAL = -1e9  # additive mask for non-edges (exp underflows to exactly 0)

OUT_LANES = 128  # lane-dense output width (first NCLASS lanes hold the result)
SLAB_ROWS = 240  # packed-parameter slab rows (see pack_slab layout below)


def _recip(d):
    # EUP approx reciprocal + one Newton step: rel err ~2^-24 << 1e-4 tolerance.
    y = pl.reciprocal(d, approx=True)
    return y * (2.0 - d * y)


def gat_net_kernel(x_ref, slab_ref, out_ref):
    x = x_ref[...]                        # [N, NFEAT]
    slab = slab_ref[...]                  # [SLAB_ROWS, 128]

    # ---- unpack the packed slab (static slices of a loaded value) ----
    bd_mask = slab[0:64, :]               # [H1*N, HC]  block-diag column mask
    w1 = slab[64:96, :]                   # [NFEAT, HC]
    b1 = slab[96:97, :]                   # [1, HC]
    par = slab[104:232, :]                # [HC, 128]   parameter block
    A1_bd = par[:, 0:2 * H1]              # [HC, 2*H1]  (a_src | a_dst) block-diag
    w2 = par[:, 2 * H1:2 * H1 + NCLASS]   # [HC, NCLASS]
    mask1 = par[0:H1 * N, 20:28]          # [H1*N, N]   additive -1e9 non-edge mask
    P_h = par[0:H1 * N, 28:36]            # [H1*N, H1]  head one-hot selector
    Q = par[0:N, 36:100]                  # [N, H1*N]   (head,dst)->dst selector
    A2 = par[0:NCLASS, 100:102]           # [NCLASS, 2] (a2_src | a2_dst)
    b2 = par[0:1, 102:106]                # [1, NCLASS]
    E = slab[232:236, :]                  # [NCLASS, 128] class->lane embedder

    # NOTE: dropout layers are identity in eval mode (training=False).
    # ------------------- GATConv layer 1 (8 heads, concat) -------------------
    hfeat = jnp.dot(x, w1, preferred_element_type=jnp.float32)          # [N, HC]
    s_all = jnp.dot(hfeat, A1_bd, preferred_element_type=jnp.float32)   # [N, 2*H1]
    s_src = s_all[:, 0:H1]                                              # [N, H1]
    s_dst = s_all[:, H1:2 * H1]                                         # [N, H1]

    # logits in [H1*N, N] layout: e[h*N+i, j] = s_dst[i,h] + s_src[j,h]
    e_src = jnp.dot(P_h, s_src.T, preferred_element_type=jnp.float32)   # [H1*N, N]
    ones_hn = jnp.ones((H1, N), jnp.float32)
    dst_full = jnp.dot(jnp.tile(s_dst, (H1, 1)) * P_h, ones_hn,
                       preferred_element_type=jnp.float32)              # [H1*N, N]
    e = e_src + dst_full
    e = jnp.where(e > 0, e, NEG_SLOPE * e) + mask1                      # LeakyReLU+mask

    m1 = jnp.max(e, axis=-1, keepdims=True)
    p1 = jnp.exp(e - m1)                                                # masked -> 0
    alpha1 = p1 * _recip(jnp.sum(p1, axis=-1, keepdims=True))           # [H1*N, N]

    # per-head aggregation: matmul + block-diag mask + MXU selector matmul
    agg = jnp.dot(alpha1, hfeat, preferred_element_type=jnp.float32)    # [H1*N, HC]
    out1 = jnp.dot(Q, agg * bd_mask, preferred_element_type=jnp.float32)  # [N, HC]
    out1 = out1 + b1
    out1 = jnp.where(out1 > 0, out1, jnp.exp(out1) - 1.0)               # ELU (alpha=1)

    # ------------------- GATConv layer 2 (1 head, no concat) -----------------
    h2 = jnp.dot(out1, w2, preferred_element_type=jnp.float32)          # [N, NCLASS]
    s2 = jnp.dot(h2, A2, preferred_element_type=jnp.float32)            # [N, 2]
    e2 = s2[:, 1:2] + s2[:, 0:1].T                                      # [N, N]
    e2 = jnp.where(e2 > 0, e2, NEG_SLOPE * e2) + mask1[0:N, :]          # reuse mask

    m2 = jnp.max(e2, axis=-1, keepdims=True)
    p2 = jnp.exp(e2 - m2)
    alpha2 = p2 * _recip(jnp.sum(p2, axis=-1, keepdims=True))           # [N, N]
    out2 = jnp.dot(alpha2, h2, preferred_element_type=jnp.float32) + b2  # [N, NCLASS]

    # ------------------- log_softmax over classes (dim=1) --------------------
    m3 = jnp.max(out2, axis=-1, keepdims=True)
    z = out2 - m3
    logp = z - jnp.log(jnp.sum(jnp.exp(z), axis=-1, keepdims=True))     # [N, NCLASS]
    # embed into lane-dense output via MXU selector (unmasked full-tile store)
    out_ref[...] = jnp.dot(logp, E, preferred_element_type=jnp.float32)  # [N, 128]


def pack_slab(adj, params):
    """Host-side, called ONCE at setup: pack all static tensors into one
    lane-dense [SLAB_ROWS, 128] slab (weights, masks, structural selectors)."""
    w1, a1s, a1d, b1, w2, a2s, a2d, b2 = params
    slab = jnp.zeros((SLAB_ROWS, 128), jnp.float32)

    # rows 0:64  block-diagonal column mask  bd[h*N+i, k] = (k // C1 == h)
    rr = jnp.arange(H1 * N)[:, None] // N
    cc = jnp.arange(HC)[None, :] // C1
    slab = slab.at[0:64, :].set((rr == cc).astype(jnp.float32))

    # rows 64:96 w1, row 96 b1
    slab = slab.at[64:96, :].set(w1)
    slab = slab.at[96:97, :].set(b1)

    # rows 104:232 parameter block (128 rows x 128 lanes)
    rows = jnp.arange(HC)
    heads = rows // C1
    A1_bd = jnp.zeros((HC, 2 * H1), jnp.float32)
    A1_bd = A1_bd.at[rows, heads].set(a1s.reshape(-1))
    A1_bd = A1_bd.at[rows, H1 + heads].set(a1d.reshape(-1))
    slab = slab.at[104:232, 0:2 * H1].set(A1_bd)
    slab = slab.at[104:232, 2 * H1:2 * H1 + NCLASS].set(w2)

    bias = jnp.where(adj > 0, 0.0, MASK_VAL).astype(jnp.float32)         # [N, N]
    slab = slab.at[104:168, 20:28].set(jnp.tile(bias, (H1, 1)))          # mask1

    r_head = jnp.arange(H1 * N)[:, None] // N
    c_head = jnp.arange(H1)[None, :]
    slab = slab.at[104:168, 28:36].set((r_head == c_head).astype(jnp.float32))  # P_h

    Qsel = (jnp.arange(N)[:, None] == (jnp.arange(H1 * N)[None, :] % N))
    slab = slab.at[104:112, 36:100].set(Qsel.astype(jnp.float32))        # Q

    A2 = jnp.concatenate([a2s.reshape(NCLASS, 1), a2d.reshape(NCLASS, 1)], axis=1)
    slab = slab.at[104:108, 100:102].set(A2)
    slab = slab.at[104:105, 102:106].set(b2)

    # rows 232:236  class->lane embedder E[c, l] = (l == c)
    Emb = (jnp.arange(NCLASS)[:, None] == jnp.arange(128)[None, :])
    slab = slab.at[232:236, :].set(Emb.astype(jnp.float32))
    return slab


def gat_net_pallas(x, slab):
    """Per-call path: one gridless pallas_call (2 lane-dense inputs)."""
    vmem = pl.BlockSpec(memory_space=pltpu.MemorySpace.VMEM)
    out = pl.pallas_call(
        gat_net_kernel,
        out_shape=jax.ShapeDtypeStruct((N, OUT_LANES), jnp.float32),
        in_specs=[vmem, vmem],
        out_specs=vmem,
    )(x, slab)
    return out[:, :NCLASS]


# ---------------------- pure-JAX reference (same math) ----------------------
def gat_net_ref(x, adj, params):
    w1, a1s, a1d, b1, w2, a2s, a2d, b2 = params
    h = x @ w1
    hh = h.reshape(N, H1, C1)
    s_src = jnp.sum(hh * a1s[None], axis=-1)
    s_dst = jnp.sum(hh * a1d[None], axis=-1)
    e = s_dst.T[:, :, None] + s_src.T[:, None, :]
    e = jnp.where(e > 0, e, NEG_SLOPE * e)
    e = jnp.where(adj[None] > 0, e, -1e30)
    e = e - jnp.max(e, axis=-1, keepdims=True)
    p = jnp.exp(e) * adj[None]
    alpha = p / jnp.sum(p, axis=-1, keepdims=True)
    out_h = jnp.einsum('hij,hjc->hic', alpha, jnp.transpose(hh, (1, 0, 2)))
    out1 = jnp.transpose(out_h, (1, 0, 2)).reshape(N, H1 * C1) + b1
    out1 = jnp.where(out1 > 0, out1, jnp.exp(out1) - 1.0)
    h2 = out1 @ w2
    s_src2 = jnp.sum(h2 * a2s, axis=-1, keepdims=True)
    s_dst2 = jnp.sum(h2 * a2d, axis=-1, keepdims=True)
    e2 = s_dst2 + s_src2.T
    e2 = jnp.where(e2 > 0, e2, NEG_SLOPE * e2)
    e2 = jnp.where(adj > 0, e2, -1e30)
    e2 = e2 - jnp.max(e2, axis=-1, keepdims=True)
    p2 = jnp.exp(e2) * adj
    alpha2 = p2 / jnp.sum(p2, axis=-1, keepdims=True)
    out2 = alpha2 @ h2 + b2
    return jax.nn.log_softmax(out2, axis=1)


if __name__ == "__main__":
    key = jax.random.PRNGKey(0)
    k_x, k_w1, k_a1s, k_a1d, k_w2, k_a2s, k_a2d = jax.random.split(key, 7)

    # Node features
    x = jax.random.normal(k_x, (N, NFEAT), dtype=jnp.float32)

    # Deterministic small graph: directed ring + a couple of chords, + self-loops.
    # edge (src=j, dst=i)  ->  adj[i, j] = 1
    src = jnp.array([0, 1, 2, 3, 4, 5, 6, 7, 0, 2, 5], dtype=jnp.int32)
    dst = jnp.array([1, 2, 3, 4, 5, 6, 7, 0, 4, 6, 1], dtype=jnp.int32)
    adj = jnp.zeros((N, N), dtype=jnp.float32).at[dst, src].set(1.0)
    adj = adj.at[jnp.arange(N), jnp.arange(N)].set(1.0)  # self-loops (PyG default)

    # Parameters (deterministic synthetic init, glorot-ish scale)
    w1 = jax.random.normal(k_w1, (NFEAT, H1 * C1), dtype=jnp.float32) * 0.2
    a1_src = jax.random.normal(k_a1s, (H1, C1), dtype=jnp.float32) * 0.2
    a1_dst = jax.random.normal(k_a1d, (H1, C1), dtype=jnp.float32) * 0.2
    b1 = jnp.zeros((1, H1 * C1), dtype=jnp.float32)
    w2 = jax.random.normal(k_w2, (H1 * C1, NCLASS), dtype=jnp.float32) * 0.1
    a2_src = jax.random.normal(k_a2s, (1, NCLASS), dtype=jnp.float32) * 0.2
    a2_dst = jax.random.normal(k_a2d, (1, NCLASS), dtype=jnp.float32) * 0.2
    b2 = jnp.zeros((1, NCLASS), dtype=jnp.float32)

    params = (w1, a1_src, a1_dst, b1, w2, a2_src, a2_dst, b2)

    # Static packing hoisted out of the per-call path (done once).
    slab = jax.block_until_ready(pack_slab(adj, params))

    out = gat_net_pallas(x, slab)
    out = jax.block_until_ready(out)

    ref = gat_net_ref(x, adj, params)
    assert out.shape == (N, NCLASS)
    assert jnp.allclose(out, ref, atol=1e-4, rtol=1e-4), "mismatch vs JAX reference"

    print("KERNEL_OK")
</pallas_src>

<mosaic_0001>
module attributes {stable_mosaic.version = 11 : i64} {
  func.func @gat_net_kernel(%arg0: memref<8x32xf32, #tpu.memory_space<vmem>>, %arg1: memref<240x128xf32, #tpu.memory_space<vmem>>, %arg2: memref<8x128xf32, #tpu.memory_space<vmem>>) attributes {dimension_semantics = [], scalar_prefetch = 0 : i64, scratch_operands = 0 : i64, tpu.core_type = #tpu.core_type<tc>} {
    %c0 = arith.constant 0 : index
    %c0_0 = arith.constant 0 : index
    %0 = vector.load %arg0[%c0, %c0_0] : memref<8x32xf32, #tpu.memory_space<vmem>>, vector<8x32xf32>
    %c0_1 = arith.constant 0 : index
    %c0_2 = arith.constant 0 : index
    %1 = vector.load %arg1[%c0_1, %c0_2] : memref<240x128xf32, #tpu.memory_space<vmem>>, vector<240x128xf32>
    %2 = vector.extract_strided_slice %1 {offsets = [0, 0], sizes = [64, 128], strides = [1, 1]} : vector<240x128xf32> to vector<64x128xf32>
    %3 = vector.extract_strided_slice %1 {offsets = [64, 0], sizes = [32, 128], strides = [1, 1]} : vector<240x128xf32> to vector<32x128xf32>
    %4 = vector.extract_strided_slice %1 {offsets = [96, 0], sizes = [1, 128], strides = [1, 1]} : vector<240x128xf32> to vector<1x128xf32>
    %5 = vector.extract_strided_slice %1 {offsets = [104, 0], sizes = [128, 128], strides = [1, 1]} : vector<240x128xf32> to vector<128x128xf32>
    %6 = vector.extract_strided_slice %5 {offsets = [0, 0], sizes = [128, 16], strides = [1, 1]} : vector<128x128xf32> to vector<128x16xf32>
    %7 = vector.extract_strided_slice %5 {offsets = [0, 16], sizes = [128, 4], strides = [1, 1]} : vector<128x128xf32> to vector<128x4xf32>
    %8 = vector.extract_strided_slice %5 {offsets = [0, 20], sizes = [64, 8], strides = [1, 1]} : vector<128x128xf32> to vector<64x8xf32>
    %9 = vector.extract_strided_slice %5 {offsets = [0, 28], sizes = [64, 8], strides = [1, 1]} : vector<128x128xf32> to vector<64x8xf32>
    %10 = vector.extract_strided_slice %5 {offsets = [0, 36], sizes = [8, 64], strides = [1, 1]} : vector<128x128xf32> to vector<8x64xf32>
    %11 = vector.extract_strided_slice %5 {offsets = [0, 100], sizes = [4, 2], strides = [1, 1]} : vector<128x128xf32> to vector<4x2xf32>
    %12 = vector.extract_strided_slice %5 {offsets = [0, 102], sizes = [1, 4], strides = [1, 1]} : vector<128x128xf32> to vector<1x4xf32>
    %13 = vector.extract_strided_slice %1 {offsets = [232, 0], sizes = [4, 128], strides = [1, 1]} : vector<240x128xf32> to vector<4x128xf32>
    %cst = arith.constant dense<0.000000e+00> : vector<8x128xf32>
    %14 = tpu.matmul %0, %3, %cst {dimension_numbers = #tpu.dot_dimension_numbers<[1], [0], [0], [1], [0, 0, 1, 1], [], []>} : vector<8x32xf32>, vector<32x128xf32>, vector<8x128xf32> -> vector<8x128xf32>
    %cst_3 = arith.constant dense<0.000000e+00> : vector<8x16xf32>
    %15 = tpu.matmul %14, %6, %cst_3 {dimension_numbers = #tpu.dot_dimension_numbers<[1], [0], [0], [1], [0, 0, 1, 1], [], []>} : vector<8x128xf32>, vector<128x16xf32>, vector<8x16xf32> -> vector<8x16xf32>
    %16 = vector.extract_strided_slice %15 {offsets = [0, 0], sizes = [8, 8], strides = [1, 1]} : vector<8x16xf32> to vector<8x8xf32>
    %17 = vector.extract_strided_slice %15 {offsets = [0, 8], sizes = [8, 8], strides = [1, 1]} : vector<8x16xf32> to vector<8x8xf32>
    %18 = tpu.transpose %16, [1, 0] : vector<8x8xf32> -> vector<8x8xf32>
    %cst_4 = arith.constant dense<0.000000e+00> : vector<64x8xf32>
    %19 = tpu.matmul %9, %18, %cst_4 {dimension_numbers = #tpu.dot_dimension_numbers<[1], [0], [0], [1], [0, 0, 1, 1], [], []>} : vector<64x8xf32>, vector<8x8xf32>, vector<64x8xf32> -> vector<64x8xf32>
    %cst_5 = arith.constant 1.000000e+00 : f32
    %20 = vector.broadcast %cst_5 : f32 to vector<8x8xf32>
    %21 = tpu.concatenate %17, %17, %17, %17, %17, %17, %17, %17 in 0 : vector<8x8xf32>, vector<8x8xf32>, vector<8x8xf32>, vector<8x8xf32>, vector<8x8xf32>, vector<8x8xf32>, vector<8x8xf32>, vector<8x8xf32> -> vector<64x8xf32>
    %22 = arith.mulf %21, %9 : vector<64x8xf32>
    %cst_6 = arith.constant dense<0.000000e+00> : vector<64x8xf32>
    %23 = tpu.matmul %22, %20, %cst_6 {dimension_numbers = #tpu.dot_dimension_numbers<[1], [0], [0], [1], [0, 0, 1, 1], [], []>} : vector<64x8xf32>, vector<8x8xf32>, vector<64x8xf32> -> vector<64x8xf32>
    %24 = arith.addf %19, %23 : vector<64x8xf32>
    %cst_7 = arith.constant 0.000000e+00 : f32
    %25 = vector.broadcast %cst_7 : f32 to vector<64x8xf32>
    %26 = arith.cmpf ogt, %24, %25 : vector<64x8xf32>
    %cst_8 = arith.constant 2.000000e-01 : f32
    %27 = vector.broadcast %cst_8 : f32 to vector<64x8xf32>
    %28 = arith.mulf %27, %24 : vector<64x8xf32>
    %29 = arith.select %26, %24, %28 : vector<64x8xi1>, vector<64x8xf32>
    %30 = arith.addf %29, %8 : vector<64x8xf32>
    %cst_9 = arith.constant dense<0xFF800000> : vector<64xf32>
    %31 = vector.multi_reduction <maximumf>, %30, %cst_9 [1] : vector<64x8xf32> to vector<64xf32>
    %32 = vector.shape_cast %31 : vector<64xf32> to vector<64x1xf32>
    %33 = vector.broadcast %32 : vector<64x1xf32> to vector<64x8xf32>
    %34 = arith.subf %30, %33 : vector<64x8xf32>
    %35 = math.exp %34 : vector<64x8xf32>
    %cst_10 = arith.constant dense<0.000000e+00> : vector<64xf32>
    %36 = vector.multi_reduction <add>, %35, %cst_10 [1] : vector<64x8xf32> to vector<64xf32>
    %37 = vector.shape_cast %36 : vector<64xf32> to vector<64x1xf32>
    %38 = tpu.reciprocal %37 {approx = true} : vector<64x1xf32> -> vector<64x1xf32>
    %39 = arith.mulf %37, %38 : vector<64x1xf32>
    %cst_11 = arith.constant 2.000000e+00 : f32
    %40 = vector.broadcast %cst_11 : f32 to vector<64x1xf32>
    %41 = arith.subf %40, %39 : vector<64x1xf32>
    %42 = arith.mulf %38, %41 : vector<64x1xf32>
    %43 = vector.broadcast %42 : vector<64x1xf32> to vector<64x8xf32>
    %44 = arith.mulf %35, %43 : vector<64x8xf32>
    %cst_12 = arith.constant dense<0.000000e+00> : vector<64x128xf32>
    %45 = tpu.matmul %44, %14, %cst_12 {dimension_numbers = #tpu.dot_dimension_numbers<[1], [0], [0], [1], [0, 0, 1, 1], [], []>} : vector<64x8xf32>, vector<8x128xf32>, vector<64x128xf32> -> vector<64x128xf32>
    %46 = arith.mulf %45, %2 : vector<64x128xf32>
    %cst_13 = arith.constant dense<0.000000e+00> : vector<8x128xf32>
    %47 = tpu.matmul %10, %46, %cst_13 {dimension_numbers = #tpu.dot_dimension_numbers<[1], [0], [0], [1], [0, 0, 1, 1], [], []>} : vector<8x64xf32>, vector<64x128xf32>, vector<8x128xf32> -> vector<8x128xf32>
    %48 = vector.broadcast %4 : vector<1x128xf32> to vector<8x128xf32>
    %49 = arith.addf %47, %48 : vector<8x128xf32>
    %cst_14 = arith.constant 0.000000e+00 : f32
    %50 = vector.broadcast %cst_14 : f32 to vector<8x128xf32>
    %51 = arith.cmpf ogt, %49, %50 : vector<8x128xf32>
    %52 = math.exp %49 : vector<8x128xf32>
    %cst_15 = arith.constant 1.000000e+00 : f32
    %53 = vector.broadcast %cst_15 : f32 to vector<8x128xf32>
    %54 = arith.subf %52, %53 : vector<8x128xf32>
    %55 = arith.select %51, %49, %54 : vector<8x128xi1>, vector<8x128xf32>
    %cst_16 = arith.constant dense<0.000000e+00> : vector<8x4xf32>
    %56 = tpu.matmul %55, %7, %cst_16 {dimension_numbers = #tpu.dot_dimension_numbers<[1], [0], [0], [1], [0, 0, 1, 1], [], []>} : vector<8x128xf32>, vector<128x4xf32>, vector<8x4xf32> -> vector<8x4xf32>
    %cst_17 = arith.constant dense<0.000000e+00> : vector<8x2xf32>
    %57 = tpu.matmul %56, %11, %cst_17 {dimension_numbers = #tpu.dot_dimension_numbers<[1], [0], [0], [1], [0, 0, 1, 1], [], []>} : vector<8x4xf32>, vector<4x2xf32>, vector<8x2xf32> -> vector<8x2xf32>
    %58 = vector.extract_strided_slice %57 {offsets = [0, 1], sizes = [8, 1], strides = [1, 1]} : vector<8x2xf32> to vector<8x1xf32>
    %59 = vector.extract_strided_slice %57 {offsets = [0, 0], sizes = [8, 1], strides = [1, 1]} : vector<8x2xf32> to vector<8x1xf32>
    %60 = tpu.transpose %59, [1, 0] : vector<8x1xf32> -> vector<1x8xf32>
    %61 = vector.broadcast %58 : vector<8x1xf32> to vector<8x8xf32>
    %62 = vector.broadcast %60 : vector<1x8xf32> to vector<8x8xf32>
    %63 = arith.addf %61, %62 : vector<8x8xf32>
    %cst_18 = arith.constant 0.000000e+00 : f32
    %64 = vector.broadcast %cst_18 : f32 to vector<8x8xf32>
    %65 = arith.cmpf ogt, %63, %64 : vector<8x8xf32>
    %cst_19 = arith.constant 2.000000e-01 : f32
    %66 = vector.broadcast %cst_19 : f32 to vector<8x8xf32>
    %67 = arith.mulf %66, %63 : vector<8x8xf32>
    %68 = arith.select %65, %63, %67 : vector<8x8xi1>, vector<8x8xf32>
    %69 = vector.extract_strided_slice %8 {offsets = [0, 0], sizes = [8, 8], strides = [1, 1]} : vector<64x8xf32> to vector<8x8xf32>
    %70 = arith.addf %68, %69 : vector<8x8xf32>
    %cst_20 = arith.constant dense<0xFF800000> : vector<8xf32>
    %71 = vector.multi_reduction <maximumf>, %70, %cst_20 [1] : vector<8x8xf32> to vector<8xf32>
    %72 = vector.shape_cast %71 : vector<8xf32> to vector<8x1xf32>
    %73 = vector.broadcast %72 : vector<8x1xf32> to vector<8x8xf32>
    %74 = arith.subf %70, %73 : vector<8x8xf32>
    %75 = math.exp %74 : vector<8x8xf32>
    %cst_21 = arith.constant dense<0.000000e+00> : vector<8xf32>
    %76 = vector.multi_reduction <add>, %75, %cst_21 [1] : vector<8x8xf32> to vector<8xf32>
    %77 = vector.shape_cast %76 : vector<8xf32> to vector<8x1xf32>
    %78 = tpu.reciprocal %77 {approx = true} : vector<8x1xf32> -> vector<8x1xf32>
    %79 = arith.mulf %77, %78 : vector<8x1xf32>
    %cst_22 = arith.constant 2.000000e+00 : f32
    %80 = vector.broadcast %cst_22 : f32 to vector<8x1xf32>
    %81 = arith.subf %80, %79 : vector<8x1xf32>
    %82 = arith.mulf %78, %81 : vector<8x1xf32>
    %83 = vector.broadcast %82 : vector<8x1xf32> to vector<8x8xf32>
    %84 = arith.mulf %75, %83 : vector<8x8xf32>
    %cst_23 = arith.constant dense<0.000000e+00> : vector<8x4xf32>
    %85 = tpu.matmul %84, %56, %cst_23 {dimension_numbers = #tpu.dot_dimension_numbers<[1], [0], [0], [1], [0, 0, 1, 1], [], []>} : vector<8x8xf32>, vector<8x4xf32>, vector<8x4xf32> -> vector<8x4xf32>
    %86 = vector.broadcast %12 : vector<1x4xf32> to vector<8x4xf32>
    %87 = arith.addf %85, %86 : vector<8x4xf32>
    %cst_24 = arith.constant dense<0xFF800000> : vector<8xf32>
    %88 = vector.multi_reduction <maximumf>, %87, %cst_24 [1] : vector<8x4xf32> to vector<8xf32>
    %89 = vector.shape_cast %88 : vector<8xf32> to vector<8x1xf32>
    %90 = vector.broadcast %89 : vector<8x1xf32> to vector<8x4xf32>
    %91 = arith.subf %87, %90 : vector<8x4xf32>
    %92 = math.exp %91 : vector<8x4xf32>
    %cst_25 = arith.constant dense<0.000000e+00> : vector<8xf32>
    %93 = vector.multi_reduction <add>, %92, %cst_25 [1] : vector<8x4xf32> to vector<8xf32>
    %94 = vector.shape_cast %93 : vector<8xf32> to vector<8x1xf32>
    %95 = math.log %94 : vector<8x1xf32>
    %96 = vector.broadcast %95 : vector<8x1xf32> to vector<8x4xf32>
    %97 = arith.subf %91, %96 : vector<8x4xf32>
    %cst_26 = arith.constant dense<0.000000e+00> : vector<8x128xf32>
    %98 = tpu.matmul %97, %13, %cst_26 {dimension_numbers = #tpu.dot_dimension_numbers<[1], [0], [0], [1], [0, 0, 1, 1], [], []>} : vector<8x4xf32>, vector<4x128xf32>, vector<8x128xf32> -> vector<8x128xf32>
    %c0_27 = arith.constant 0 : index
    %c0_28 = arith.constant 0 : index
    %99 = vector.load %arg2[%c0_27, %c0_28] : memref<8x128xf32, #tpu.memory_space<vmem>>, vector<8x128xf32>
    tpu.vector_store %arg2[%c0_27, %c0_28], %98 {strides = array<i32>} : memref<8x128xf32, #tpu.memory_space<vmem>>, vector<8x128xf32>,
    return
  }
}

</mosaic_0001>

<bundles_post_ra>
// kernel: tpu_custom_call.1
= control target key start
LH: loop header
LB: loop body
LE: loop exit
PB: predicated region body
PF: predicated region fallthrough
CT: control target
= control target key end

     0   :  { %7 = vsyncpa [#allocation3], 0  ;;  %s2039_s0 = inlined_call_operand.hbm [shape: f32[8,32], index: 0, kind: input, shape index: {}]   ;;  %s2040_s1 = inlined_call_operand.hbm [shape: f32[240,128], index: 1, kind: input, shape index: {}]   ;;  %s2041_s2 = inlined_call_operand.hbm [shape: f32[8,128], index: 2, kind: output, shape index: {}]  }
   0x1   :  { %8 = vsyncpa [#allocation6], 0 }
   0x2   :  { %9 = vsyncpa [#allocation4], 0  ;;  %s1751_s9 = smov [#allocation2]   ;;  %s1752_s11 = smov [#allocation5]  }
   0x3   :  { %s16_s10 = sshll.u32 %s1751_s9, 4  ;;  %s25_s12 = sshll.u32 %s1752_s11, 4  ;;  %s17_s10 = int_to_ptr.vmem [resolvable:$true] %s16_s10  ;;  %s26_s12 = int_to_ptr.vmem [resolvable:$true] %s25_s12 }
   0x4   :  { %s1693_s13 = scalar_lea.vmem %s17_s10, 128  ;;  %p1698_p1 = scmp.lt.s32.totalorder %s17_s10, %s17_s10 }
   0x5   :  { %p1694_p0 = scmp.ne.s32.totalorder %s17_s10, %s1693_s13  ;;  %p1699_p2 = scmp.lt.s32.totalorder %s1693_s13, %s1693_s13 }
   0x7   :  { %p1700_p3 = por %p1699_p2, %p1698_p1 }
   0x9   :  { %p1701_p4 = pnand %p1700_p3, %p1694_p0 }
   0xb   :  { %1704 = shalt.err (!%p1701_p4)
}
   0xc   :  { %19 = dma.hbm_to_vmem [thread:$0]  %s2039_s0, 128, %s17_s10, [#allocation3]  }
   0xd   :  { %s1713_s16 = scalar_lea.vmem %s26_s12, 3840  ;;  %p1718_p6 = scmp.lt.s32.totalorder %s26_s12, %s26_s12 }
   0xe   :  { %p1714_p5 = scmp.ne.s32.totalorder %s26_s12, %s1713_s16  ;;  %p1719_p7 = scmp.lt.s32.totalorder %s1713_s16, %s1713_s16 }
  0x10   :  { %p1720_p8 = por %p1719_p7, %p1718_p6 }
  0x12   :  { %p1721_p9 = pnand %p1720_p8, %p1714_p5 }
  0x14   :  { %1724 = shalt.err (!%p1721_p9)
}
  0x15   :  { %s1753_s17 = smov 128   ;;  %s1754_s18 = smov 8  }
  0x16   :  { %31 = dma.hbm_to_vmem [thread:$0]  %s2040_s1, 3840, %s26_s12, [#allocation6], %s1753_s17, %s1753_s17, %s1754_s18  }
  0x17   :  { %1745 = dma.done.wait [#allocation3], 128  }
  0x18   :  { %1746 = vsyncadd [#allocation3], 4294967168 }
  0x19   :  { %1747 = dma.done.wait [#allocation6], 3840  }
  0x1a   :  { %1748 = vsyncadd [#allocation6], 4294963456  ;;  %v1755_v0 = vmov 0.0   ;;  %vm1756_vm0 = vmmov 0   ;;  %v50_v1 = vld [vmem:[#allocation5 + $0x58] sm:$0xff]  ;;  %v49_v2 = vld [vmem:[#allocation5 + $0x50] sm:$0xff] }
  0x1b   :  { %1469 = vmatprep.subr.mxu0 %v1755_v0  ;;  %1477 = vmatprep.mubr.msk.f32.mxu0 %vm1756_vm0, %v1755_v0  ;;  %v1794_v3 = vld [vmem:[#allocation5 + $0xe0] sm:$0xff]  ;;  %v48_v4 = vld [vmem:[#allocation5 + $0x48] sm:$0xff]  ;;  %v1798_v5 = vld [vmem:[#allocation5 + $0xd8] sm:$0xff]  ;;  %vm69_vm1 = vcmask 261120   ;;  %s1757_s0 = smov 108   ;;  %v1758_v22 = vmov 1.0  }
  0x1c   :  { %1480 = vmatprep.subr.mxu1 %v1755_v0  ;;  %1512 = vmatprep.mubr.msk.f32.mxu1 %vm1756_vm0, %v1755_v0  ;;  %v1801_v6 = vld [vmem:[#allocation5 + $0xd0] sm:$0xff]  ;;  %v47_v7 = vld [vmem:[#allocation5 + $0x40] sm:$0xff]  ;;  %v38_v8 = vld [vmem:[#allocation2] sm:$0xff]  ;;  %vm277_vm2 = vcmask 64512   ;;  %s1759_s1 = smov 120   ;;  %s1760_s21 = smov 100  }
  0x1d   :  { %1470 = vmatpush3.msra.mxu0 %v50_v1  ;;  %1481 = vmatpush3.msra.mxu1 %v1794_v3  ;;  %v1806_v9 = vld [vmem:[#allocation5 + $0xc8] sm:$0xff]  ;;  %v1811_v10 = vld [vmem:[#allocation5 + $0xc0] sm:$0xff]  ;;  %v1815_v11 = vld [vmem:[#allocation5 + $0xb8] sm:$0xff]  ;;  %s1761_s22 = smov 92   ;;  %s1762_s23 = smov 112   ;;  %vm826_vm11 = vcmask 523264  }
  0x1e   :  { %1471 = vmatprep.subr.mxu0 %v1755_v0  ;;  %1482 = vmatprep.subr.mxu1 %v1755_v0  ;;  %v1819_v12 = vld [vmem:[#allocation5 + $0xb0] sm:$0xff]  ;;  %v1823_v13 = vld [vmem:[#allocation5 + $0xa8] sm:$0xff]  ;;  %v1827_v14 = vld [vmem:[#allocation5 + $0xa0] sm:$0xff]  ;;  %s1763_s24 = smov 28   ;;  %vm1036_vm12 = vcmask 1043456   ;;  %vm1032_vm14 = vcmask 31744  }
  0x1f   :  { %1472 = vmatpush3.msra.mxu0 %v49_v2  ;;  %1483 = vmatpush3.msra.mxu1 %v1798_v5  ;;  %v1831_v15 = vld [vmem:[#allocation5 + $0x98] sm:$0xff]  ;;  %v1835_v16 = vld [vmem:[#allocation5 + $0x90] sm:$0xff]  ;;  %v1839_v17 = vld [vmem:[#allocation5 + $0x88] sm:$0xff]  ;;  %s1765_s25 = smov 26   ;;  %s1766_s26 = smov [#allocation7]  }
  0x20   :  { %1473 = vmatprep.subr.mxu0 %v1755_v0  ;;  %1484 = vmatprep.subr.mxu1 %v1755_v0  ;;  %v1843_v18 = vld [vmem:[#allocation5 + $0x80] sm:$0xff]  ;;  %v1847_v19 = vld [vmem:[#allocation5 + $0x78] sm:$0xff]  ;;  %v1851_v20 = vld [vmem:[#allocation5 + $0x70] sm:$0xff]  ;;  %s1345_s27 = sshll.u32 %s1766_s26, 4  ;;  %s1346_s27 = int_to_ptr.vmem [resolvable:$true] %s1345_s27 }
  0x21   :  { %1474 = vmatpush3.msra.mxu0 %v48_v4  ;;  %1485 = vmatpush3.msra.mxu1 %v1801_v6  ;;  %v1857_v21 = vld [vmem:[#allocation5 + $0x68] sm:$0xff]  ;;  %s1725_s28 = scalar_lea.vmem %s1346_s27, 128  ;;  %p1730_p11 = scmp.lt.s32.totalorder %s1346_s27, %s1346_s27 }
  0x22   :  { %1475 = vmatprep.subr.mxu0 %v1755_v0  ;;  %1486 = vmatprep.subr.mxu1 %v1755_v0  ;;  %p1726_p10 = scmp.ne.s32.totalorder %s1346_s27, %s1725_s28  ;;  %p1731_p12 = scmp.lt.s32.totalorder %s1725_s28, %s1725_s28 }
  0x23   :  { %1476 = vmatpush3.msra.mxu0 %v47_v7  ;;  %1487 = vmatpush3.msra.mxu1 %v1806_v9 }
  0x24   :  { %1478 = vmatmul.mubr.msk.f32.vlgmr.msra.gmra.mxu0 %vm69_vm1, %v38_v8  ;;  %1488 = vmatprep.subr.mxu1 %v1755_v0  ;;  %p1732_p13 = por %p1731_p12, %p1730_p11 }
  0x25   :  { %1489 = vmatpush3.msra.mxu1 %v1811_v10  ;;  %225 = vrot.lane.b32.xlu1 %v1847_v19, %s1757_s0 }
  0x26   :  { %1490 = vmatprep.subr.mxu1 %v1755_v0  ;;  %221 = vrot.lane.b32.xlu0 %v1857_v21, %s1757_s0  ;;  %p1733_p0 = pnand %p1732_p13, %p1726_p10 }
  0x27   :  { %1491 = vmatpush3.msra.mxu1 %v1815_v11  ;;  %1515 = vmatprep.subr.mxu0 %v1758_v22 }
  0x28   :  { %1492 = vmatprep.subr.mxu1 %v1755_v0  ;;  %1516 = vmatpush3.msra.mxu0 %v1758_v22 }
  0x29   :  { %1493 = vmatpush3.msra.mxu1 %v1819_v12  ;;  %227 = vrot.lane.b32.xlu1 %v1843_v18, %s1757_s0 }
  0x2a   :  { %1494 = vmatprep.subr.mxu1 %v1755_v0  ;;  %223 = vrot.lane.b32.xlu0 %v1851_v20, %s1757_s0 }
  0x2b   :  { %1495 = vmatpush3.msra.mxu1 %v1823_v13 }
  0x2c   :  { %1496 = vmatprep.subr.mxu1 %v1755_v0 }
  0x2d   :  { %1497 = vmatpush3.msra.mxu1 %v1827_v14  ;;  %231 = vrot.lane.b32.xlu1 %v1835_v16, %s1757_s0 }
  0x2e   :  { %1498 = vmatprep.subr.mxu1 %v1755_v0  ;;  %229 = vrot.lane.b32.xlu0 %v1839_v17, %s1757_s0 }
  0x2f   :  { %1499 = vmatpush3.msra.mxu1 %v1831_v15 }
  0x30   :  { %1500 = vmatprep.subr.mxu1 %v1755_v0 }
  0x31   :  { %1501 = vmatpush3.msra.mxu1 %v1835_v16  ;;  %235 = vrot.lane.b32.xlu1 %v1827_v14, %s1757_s0 }
  0x32   :  { %1502 = vmatprep.subr.mxu1 %v1755_v0  ;;  %233 = vrot.lane.b32.xlu0 %v1831_v15, %s1757_s0 }
  0x33   :  { %1503 = vmatpush3.msra.mxu1 %v1839_v17 }
  0x34   :  { %1504 = vmatprep.subr.mxu1 %v1755_v0 }
  0x35   :  { %1505 = vmatpush3.msra.mxu1 %v1843_v18 }
  0x36   :  { %1506 = vmatprep.subr.mxu1 %v1755_v0 }
  0x37   :  { %1507 = vmatpush3.msra.mxu1 %v1847_v19 }
  0x38   :  { %1508 = vmatprep.subr.mxu1 %v1755_v0 }
  0x39   :  { %1509 = vmatpush3.msra.mxu1 %v1851_v20 }
  0x3a   :  { %1510 = vmatprep.subr.mxu1 %v1755_v0 }
  0x3b   :  { %1511 = vmatpush3.msra.mxu1 %v1857_v21 }
  0x97   :  { %v1869_v25 = vpop.permute.xlu1 %225 }
  0x98   :  { %v1871_v26 = vpop.permute.xlu0 %221 }
  0x9b   :  { %v1873_v27 = vpop.permute.xlu1 %227 }
  0x9c   :  { %v1875_v28 = vpop.permute.xlu0 %223 }
  0x9f   :  { %v1880_v33 = vpop.permute.xlu1 %231 }
  0xa0   :  { %v1882_v34 = vpop.permute.xlu0 %229 }
  0xa3   :  { %v1888_v39 = vpop.permute.xlu1 %235 }
  0xa4   :  { %v1890_v40 = vpop.permute.xlu0 %233 }
  0xe4   :  { %v139_v23 = vpop.f32.mrf.mxu0 }
  0xe5   :  { %1513 = vmatmul.mubr.f32.vlgmr.msra.gmra.mxu1 %v139_v23  ;;  %1543 = vmatprep.subr.mxu1 %v139_v23 }
  0xe6   :  { %v1479_v24 = vpop.f32.mrf.mxu0  ;;  %1544 = vmatpush3.msra.mxu1 %v139_v23 }
  0xe7   :  { %1576 = vmatprep.subr.mxu1 %v1755_v0 }
 0x1a5   :  { %v209_v29 = vpop.f32.mrf.mxu1 }
 0x1a6   :  { %1529 = vmatprep.subr.msk.mxu0 %vm277_vm2, %v209_v29  ;;  %v246_v30 = vmul.f32 %v1875_v28, %v209_v29  ;;  %v245_v31 = vmul.f32 %v1871_v26, %v209_v29  ;;  %v248_v35 = vmul.f32 %v1873_v27, %v209_v29  ;;  %v247_v36 = vmul.f32 %v1869_v25, %v209_v29 }
 0x1a7   :  { %v1514_v32 = vpop.f32.mrf.mxu1  ;;  %v250_v37 = vmul.f32 %v1880_v33, %v209_v29  ;;  %v249_v38 = vmul.f32 %v1882_v34, %v209_v29  ;;  %v252_v41 = vmul.f32 %v1888_v39, %v209_v29  ;;  %v251_v42 = vmul.f32 %v1890_v40, %v209_v29 }
 0x1a8   :  { %263 = vrot.lane.b32.xlu1 %v246_v30, %s1759_s1  ;;  %261 = vrot.lane.b32.xlu0 %v245_v31, %s1759_s1 }
 0x1ac   :  { %267 = vrot.lane.b32.xlu1 %v248_v35, %s1759_s1  ;;  %265 = vrot.lane.b32.xlu0 %v247_v36, %s1759_s1 }
 0x1b0   :  { %271 = vrot.lane.b32.xlu1 %v250_v37, %s1759_s1  ;;  %269 = vrot.lane.b32.xlu0 %v249_v38, %s1759_s1 }
 0x1b4   :  { %275 = vrot.lane.b32.xlu1 %v252_v41, %s1759_s1  ;;  %273 = vrot.lane.b32.xlu0 %v251_v42, %s1759_s1 }
 0x1b8   :  { %399 = vrot.lane.b32.xlu0 %v1857_v21, %s1760_s21  ;;  %401 = vrot.lane.b32.xlu1 %v1851_v20, %s1760_s21 }
 0x1bc   :  { %403 = vrot.lane.b32.xlu0 %v1847_v19, %s1760_s21  ;;  %405 = vrot.lane.b32.xlu1 %v1843_v18, %s1760_s21 }
 0x1c0   :  { %407 = vrot.lane.b32.xlu0 %v1839_v17, %s1760_s21  ;;  %409 = vrot.lane.b32.xlu1 %v1835_v16, %s1760_s21 }
 0x1c4   :  { %411 = vrot.lane.b32.xlu0 %v1831_v15, %s1760_s21  ;;  %413 = vrot.lane.b32.xlu1 %v1827_v14, %s1760_s21 }
 0x21a   :  { %v264_v43 = vpop.permute.xlu1 %263  ;;  %v262_v44 = vpop.permute.xlu0 %261 }
 0x21b   :  { %1517 = vmatprep.mubr.msk.f32.mxu0 %vm277_vm2, %v262_v44 }
 0x21c   :  { %1518 = vmatmul.mubr.msk.f32.vlgmr.msra.gmra.mxu0 %vm277_vm2, %v264_v43 }
 0x21d   :  { %1530 = vmatpush3.xpose.msk.msra.mxu0 %vm277_vm2, %v209_v29 }
 0x21e   :  { %v268_v45 = vpop.permute.xlu1 %267  ;;  %v266_v46 = vpop.permute.xlu0 %265  ;;  %1557 = vmatprep.subr.mxu0 %v1755_v0 }
 0x21f   :  { %1520 = vmatprep.mubr.msk.f32.mxu0 %vm277_vm2, %v266_v46 }
 0x220   :  { %1521 = vmatmul.mubr.msk.f32.gmra.mxu0 %vm277_vm2, %v268_v45 }
 0x222   :  { %v272_v47 = vpop.permute.xlu1 %271  ;;  %v270_v48 = vpop.permute.xlu0 %269 }
 0x223   :  { %1523 = vmatprep.mubr.msk.f32.mxu0 %vm277_vm2, %v270_v48 }
 0x224   :  { %1524 = vmatmul.mubr.msk.f32.gmra.mxu0 %vm277_vm2, %v272_v47 }
 0x226   :  { %v276_v49 = vpop.permute.xlu1 %275  ;;  %v274_v50 = vpop.permute.xlu0 %273 }
 0x227   :  { %1526 = vmatprep.mubr.msk.f32.mxu0 %vm277_vm2, %v274_v50 }
 0x228   :  { %1527 = vmatmul.mubr.msk.f32.gmra.mxu0 %vm277_vm2, %v276_v49 }
 0x22a   :  { %v400_v51 = vpop.permute.xlu0 %399  ;;  %v402_v52 = vpop.permute.xlu1 %401 }
 0x22b   :  { %1531 = vmatprep.mubr.msk.f32.mxu0 %vm277_vm2, %v400_v51 }
 0x22c   :  { %1532 = vmatmul.mubr.msk.f32.vlgmr.msra.gmra.mxu0 %vm277_vm2, %v402_v52 }
 0x22e   :  { %v404_v53 = vpop.permute.xlu0 %403  ;;  %v406_v54 = vpop.permute.xlu1 %405 }
 0x22f   :  { %1534 = vmatprep.mubr.msk.f32.mxu0 %vm277_vm2, %v404_v53 }
 0x230   :  { %1535 = vmatmul.mubr.msk.f32.gmra.mxu0 %vm277_vm2, %v406_v54 }
 0x232   :  { %v408_v55 = vpop.permute.xlu0 %407  ;;  %v410_v56 = vpop.permute.xlu1 %409 }
 0x233   :  { %1537 = vmatprep.mubr.msk.f32.mxu0 %vm277_vm2, %v408_v55 }
 0x234   :  { %1538 = vmatmul.mubr.msk.f32.gmra.mxu0 %vm277_vm2, %v410_v56 }
 0x236   :  { %v412_v57 = vpop.permute.xlu0 %411  ;;  %v414_v58 = vpop.permute.xlu1 %413 }
 0x237   :  { %1540 = vmatprep.mubr.msk.f32.mxu0 %vm277_vm2, %v412_v57 }
 0x238   :  { %1541 = vmatmul.mubr.msk.f32.gmra.mxu0 %vm277_vm2, %v414_v58 }
 0x239   :  { %1573 = vmatprep.mubr.msk.f32.mxu0 %vm1756_vm0, %v1755_v0 }
 0x2dc   :  { %v1519_v59 = vpop.f32.mrf.mxu0 }
 0x2de   :  { %v360_v60 = vpop.f32.mrf.mxu0 }
 0x2e0   :  { %v1522_v61 = vpop.f32.mrf.mxu0 }
 0x2e2   :  { %v370_v62 = vpop.f32.mrf.mxu0 }
 0x2e4   :  { %v1525_v63 = vpop.f32.mrf.mxu0 }
 0x2e6   :  { %v380_v1 = vpop.f32.mrf.mxu0 }
 0x2e8   :  { %v1528_v2 = vpop.f32.mrf.mxu0 }
 0x2ea   :  { %v390_v4 = vpop.f32.mrf.mxu0 }
 0x2ec   :  { %v1533_v7 = vpop.f32.mrf.mxu0 }
 0x2ed   :  { %v506_v8 = vadd.f32 %v1533_v7, %v1519_v59 }
 0x2ee   :  { %v500_v22 = vpop.f32.mrf.mxu0 }
 0x2ef   :  { %vm540_vm3 = vcmp.gt.f32.partialorder %v506_v8, 0.0  ;;  %v548_v23 = vmul.f32 0.2, %v506_v8  ;;  %v501_v24 = vadd.f32 %v500_v22, %v360_v60 }
 0x2f0   :  { %v1536_v29 = vpop.f32.mrf.mxu0 }
 0x2f1   :  { %vm539_vm4 = vcmp.gt.f32.partialorder %v501_v24, 0.0  ;;  %v547_v30 = vmul.f32 0.2, %v501_v24  ;;  %v516_v31 = vadd.f32 %v1536_v29, %v1522_v61  ;;  %v556_v32 = vsel %vm540_vm3, %v506_v8, %v548_v23 }
 0x2f2   :  { %v510_v35 = vpop.f32.mrf.mxu0  ;;  %v564_v36 = vadd.f32 %v556_v32, %v1875_v28 }
 0x2f3   :  { %v550_v37 = vmul.f32 0.2, %v516_v31  ;;  %v511_v38 = vadd.f32 %v510_v35, %v370_v62  ;;  %v555_v41 = vsel %vm539_vm4, %v501_v24, %v547_v30  ;;  %vm542_vm5 = vcmp.gt.f32.partialorder %v516_v31, 0.0 }
 0x2f4   :  { %v1539_v42 = vpop.f32.mrf.mxu0  ;;  %v574_v43 = vsel %vm277_vm2, %v564_v36, -inf  ;;  %v563_v44 = vadd.f32 %v555_v41, %v1871_v26 }
 0x2f5   :  { %vm541_vm6 = vcmp.gt.f32.partialorder %v511_v38, 0.0  ;;  %v549_v45 = vmul.f32 0.2, %v511_v38  ;;  %v526_v46 = vadd.f32 %v1539_v42, %v1525_v63  ;;  %575 = vmax.xlane.f32.xlu1 %v574_v43  ;;  %v558_v51 = vsel %vm542_vm5, %v516_v31, %v550_v37 }
 0x2f6   :  { %v520_v47 = vpop.f32.mrf.mxu0  ;;  %v571_v48 = vsel %vm277_vm2, %v563_v44, -inf  ;;  %v566_v58 = vadd.f32 %v558_v51, %v1873_v27 }
 0x2f7   :  { %v552_v49 = vmul.f32 0.2, %v526_v46  ;;  %v521_v50 = vadd.f32 %v520_v47, %v380_v1  ;;  %572 = vmax.xlane.f32.xlu0 %v571_v48  ;;  %v557_v28 = vsel %vm541_vm6, %v511_v38, %v549_v45  ;;  %vm544_vm7 = vcmp.gt.f32.partialorder %v526_v46, 0.0 }
 0x2f8   :  { %v1542_v52 = vpop.f32.mrf.mxu0  ;;  %v565_v53 = vadd.f32 %v557_v28, %v1869_v25  ;;  %v580_v7 = vsel %vm277_vm2, %v566_v58, -inf }
 0x2f9   :  { %vm543_vm8 = vcmp.gt.f32.partialorder %v521_v50, 0.0  ;;  %v551_v54 = vmul.f32 0.2, %v521_v50  ;;  %v536_v55 = vadd.f32 %v1542_v52, %v1528_v2  ;;  %v560_v62 = vsel %vm544_vm7, %v526_v46, %v552_v49 }
 0x2fa   :  { %v530_v56 = vpop.f32.mrf.mxu0  ;;  %v577_v57 = vsel %vm277_vm2, %v565_v53, -inf  ;;  %v568_v2 = vadd.f32 %v560_v62, %v1880_v33 }
 0x2fb   :  { %v554_v59 = vmul.f32 0.2, %v536_v55  ;;  %v531_v60 = vadd.f32 %v530_v56, %v390_v4  ;;  %578 = vmax.xlane.f32.xlu0 %v577_v57  ;;  %v559_v61 = vsel %vm543_vm8, %v521_v50, %v551_v54  ;;  %vm546_vm9 = vcmp.gt.f32.partialorder %v536_v55, 0.0 }
 0x2fc   :  { %v567_v63 = vadd.f32 %v559_v61, %v1882_v34  ;;  %v586_v23 = vsel %vm277_vm2, %v568_v2, -inf }
 0x2fd   :  { %vm545_vm10 = vcmp.gt.f32.partialorder %v531_v60, 0.0  ;;  %v553_v1 = vmul.f32 0.2, %v531_v60  ;;  %v562_v27 = vsel %vm546_vm9, %v536_v55, %v554_v59 }
 0x2fe   :  { %v583_v25 = vsel %vm277_vm2, %v567_v63, -inf  ;;  %v570_v34 = vadd.f32 %v562_v27, %v1888_v39 }
 0x2ff   :  { %584 = vmax.xlane.f32.xlu1 %v583_v25  ;;  %581 = vmax.xlane.f32.xlu0 %v580_v7  ;;  %v561_v8 = vsel %vm545_vm10, %v531_v60, %v553_v1 }
 0x300   :  { %v569_v4 = vadd.f32 %v561_v8, %v1890_v40  ;;  %v592_v24 = vsel %vm277_vm2, %v570_v34, -inf }
 0x302   :  { %v589_v22 = vsel %vm277_vm2, %v569_v4, -inf }
 0x303   :  { %590 = vmax.xlane.f32.xlu1 %v589_v22  ;;  %587 = vmax.xlane.f32.xlu0 %v586_v23 }
 0x307   :  { %593 = vmax.xlane.f32.xlu0 %v592_v24 }
 0x37e   :  { %v576_v29 = vpop.xlane.xlu1 %575 }
 0x37f   :  { %v596_v30 = vsub.f32 %v564_v36, %v576_v29 }
 0x380   :  { %v573_v33 = vpop.xlane.xlu0 %572 }
 0x381   :  { %v605_v31 = vmul.f32 1.442695, %v596_v30  ;;  %v595_v32 = vsub.f32 %v563_v44, %v573_v33 }
 0x383   :  { %1643 = vpow2.f32 %v605_v31  ;;  %v603_v35 = vmul.f32 1.442695, %v595_v32 }
 0x384   :  { %v579_v37 = vpop.xlane.xlu0 %578 }
 0x385   :  { %1645 = vpow2.f32 %v603_v35  ;;  %v597_v40 = vsub.f32 %v565_v53, %v579_v37 }
 0x387   :  { %v607_v38 = vmul.f32 1.442695, %v597_v40 }
 0x388   :  { %v585_v41 = vpop.xlane.xlu1 %584  ;;  %v582_v42 = vpop.xlane.xlu0 %581 }
 0x389   :  { %1647 = vpow2.f32 %v607_v38  ;;  %v599_v39 = vsub.f32 %v567_v63, %v585_v41  ;;  %v598_v43 = vsub.f32 %v566_v58, %v582_v42 }
 0x38b   :  { %v611_v45 = vmul.f32 1.442695, %v599_v39  ;;  %v609_v46 = vmul.f32 1.442695, %v598_v43 }
 0x38c   :  { %v591_v47 = vpop.xlane.xlu1 %590  ;;  %v588_v48 = vpop.xlane.xlu0 %587 }
 0x38d   :  { %1649 = vpow2.f32 %v611_v45  ;;  %v601_v36 = vsub.f32 %v569_v4, %v591_v47  ;;  %v600_v49 = vsub.f32 %v568_v2, %v588_v48 }
 0x38e   :  { %1651 = vpow2.f32 %v609_v46 }
 0x38f   :  { %v615_v44 = vmul.f32 1.442695, %v601_v36  ;;  %v613_v50 = vmul.f32 1.442695, %v600_v49 }
 0x390   :  { %v1644_v28 = vpop.eup %1643  ;;  %v594_v51 = vpop.xlane.xlu0 %593 }
 0x391   :  { %1653 = vpow2.f32 %v615_v44  ;;  %v602_v52 = vsub.f32 %v570_v34, %v594_v51  ;;  %v622_v53 = vsel %vm277_vm2, %v1644_v28, 0.0 }
 0x392   :  { %v1646_v54 = vpop.eup %1645  ;;  %1655 = vpow2.f32 %v613_v50  ;;  %623 = vadd.xlane.f32.xlu0 %v622_v53 }
 0x393   :  { %v617_v55 = vmul.f32 1.442695, %v602_v52  ;;  %v619_v56 = vsel %vm277_vm2, %v1646_v54, 0.0 }
 0x394   :  { %620 = vadd.xlane.f32.xlu1 %v619_v56 }
 0x395   :  { %1657 = vpow2.f32 %v617_v55 }
 0x396   :  { %v1648_v57 = vpop.eup %1647 }
 0x397   :  { %v625_v58 = vsel %vm277_vm2, %v1648_v57, 0.0 }
 0x398   :  { %626 = vadd.xlane.f32.xlu1 %v625_v58 }
 0x39a   :  { %v1941_v59 = vpop.eup %1649 }
 0x39b   :  { %v1943_v60 = vpop.eup %1651  ;;  %v631_v61 = vsel %vm277_vm2, %v1941_v59, 0.0 }
 0x39c   :  { %632 = vadd.xlane.f32.xlu1 %v631_v61  ;;  %v628_v62 = vsel %vm277_vm2, %v1943_v60, 0.0 }
 0x39d   :  { %629 = vadd.xlane.f32.xlu0 %v628_v62 }
 0x39e   :  { %v1949_v63 = vpop.eup %1653 }
 0x39f   :  { %v1951_v1 = vpop.eup %1655  ;;  %v637_v25 = vsel %vm277_vm2, %v1949_v63, 0.0 }
 0x3a0   :  { %638 = vadd.xlane.f32.xlu1 %v637_v25  ;;  %v634_v7 = vsel %vm277_vm2, %v1951_v1, 0.0 }
 0x3a1   :  { %635 = vadd.xlane.f32.xlu0 %v634_v7 }
 0x3a2   :  { %v1957_v2 = vpop.eup %1657 }
 0x3a3   :  { %v640_v8 = vsel %vm277_vm2, %v1957_v2, 0.0 }
 0x3a5   :  { %641 = vadd.xlane.f32.xlu0 %v640_v8 }
 0x3b1   :  { %824 = vrot.lane.b32.xlu1 %v1857_v21, %s1761_s22 }
 0x3b5   :  { %940 = vrot.lane.b32.xlu1 %v1798_v5, %s1762_s23 }
 0x3b9   :  { %938 = vrot.lane.b32.xlu1 %v1801_v6, %s1762_s23 }
 0x3bb   :  { %942 = vrot.lane.b32.xlu0 %v1794_v3, %s1762_s23 }
 0x3bd   :  { %934 = vrot.lane.b32.xlu1 %v1811_v10, %s1762_s23 }
 0x3bf   :  { %936 = vrot.lane.b32.xlu0 %v1806_v9, %s1762_s23 }
 0x3c1   :  { %930 = vrot.lane.b32.xlu1 %v1819_v12, %s1762_s23  ;;  %v46_v12 = vld [vmem:[#allocation5 + $0x38] sm:$0xff] }
 0x3c3   :  { %932 = vrot.lane.b32.xlu0 %v1815_v11, %s1762_s23 }
 0x3c5   :  { %926 = vrot.lane.b32.xlu1 %v1827_v14, %s1762_s23  ;;  %v45_v14 = vld [vmem:[#allocation5 + $0x30] sm:$0xff] }
 0x3c7   :  { %928 = vrot.lane.b32.xlu0 %v1823_v13, %s1762_s23 }
 0x3c9   :  { %922 = vrot.lane.b32.xlu1 %v1835_v16, %s1762_s23 }
 0x3cb   :  { %924 = vrot.lane.b32.xlu0 %v1831_v15, %s1762_s23 }
 0x3cd   :  { %918 = vrot.lane.b32.xlu1 %v1843_v18, %s1762_s23 }
 0x3cf   :  { %920 = vrot.lane.b32.xlu0 %v1839_v17, %s1762_s23  ;;  %v44_v17 = vld [vmem:[#allocation5 + $0x28] sm:$0xff] }
 0x3d1   :  { %914 = vrot.lane.b32.xlu1 %v1851_v20, %s1762_s23 }
 0x3d3   :  { %916 = vrot.lane.b32.xlu0 %v1847_v19, %s1762_s23  ;;  %v43_v19 = vld [vmem:[#allocation5 + $0x20] sm:$0xff] }
 0x3d5   :  { %1030 = vrot.lane.b32.xlu1 %v1857_v21, %s1763_s24 }
 0x3d7   :  { %912 = vrot.lane.b32.xlu0 %v1857_v21, %s1762_s23 }
 0x41b   :  { %v624_v27 = vpop.xlane.xlu0 %623 }
 0x41c   :  { %1659 = vrcp.f32 %v624_v27 }
 0x41d   :  { %v621_v4 = vpop.xlane.xlu1 %620 }
 0x41e   :  { %1661 = vrcp.f32 %v621_v4 }
 0x421   :  { %v627_v22 = vpop.xlane.xlu1 %626 }
 0x422   :  { %1663 = vrcp.f32 %v627_v22 }
 0x425   :  { %v633_v23 = vpop.xlane.xlu1 %632 }
 0x426   :  { %1665 = vrcp.f32 %v633_v23  ;;  %v630_v34 = vpop.xlane.xlu0 %629 }
 0x427   :  { %1667 = vrcp.f32 %v630_v34 }
 0x429   :  { %v1660_v24 = vpop.eup %1659  ;;  %v639_v29 = vpop.xlane.xlu1 %638 }
 0x42a   :  { %v652_v30 = vmul.f32 %v1660_v24, %v624_v27  ;;  %1669 = vrcp.f32 %v639_v29  ;;  %v636_v33 = vpop.xlane.xlu0 %635 }
 0x42b   :  { %v1662_v31 = vpop.eup %1661  ;;  %1671 = vrcp.f32 %v636_v33 }
 0x42c   :  { %v660_v32 = vsub.f32 2.0, %v652_v30  ;;  %v651_v35 = vmul.f32 %v1662_v31, %v621_v4  ;;  %v41_v30 = vld [vmem:[#allocation5 + $0x10] sm:$0xff] }
 0x42d   :  { %v825_v16 = vpop.permute.xlu1 %824 }
 0x42e   :  { %v659_v37 = vsub.f32 2.0, %v651_v35  ;;  %v642_v40 = vpop.xlane.xlu0 %641  ;;  %v668_v41 = vmul.f32 %v1660_v24, %v660_v32  ;;  %v40_v35 = vld [vmem:[#allocation5 + $0x8] sm:$0xff] }
 0x42f   :  { %v1664_v38 = vpop.eup %1663  ;;  %1673 = vrcp.f32 %v642_v40 }
 0x430   :  { %v667_v42 = vmul.f32 %v1662_v31, %v659_v37  ;;  %v653_v39 = vmul.f32 %v1664_v38, %v627_v22  ;;  %v676_v47 = vmul.f32 %v1644_v28, %v668_v41 }
 0x432   :  { %v675_v43 = vmul.f32 %v1646_v54, %v667_v42  ;;  %v661_v45 = vsub.f32 2.0, %v653_v39 }
 0x433   :  { %v1666_v46 = vpop.eup %1665 }
 0x434   :  { %v1668_v48 = vpop.eup %1667  ;;  %v669_v36 = vmul.f32 %v1664_v38, %v661_v45  ;;  %v655_v49 = vmul.f32 %v1666_v46, %v633_v23  ;;  %1545 = vmatprep.mubr.msk.f32.mxu1 %vm277_vm2, %v675_v43 }
 0x435   :  { %v654_v44 = vmul.f32 %v1668_v48, %v630_v34  ;;  %1546 = vmatmul.mubr.msk.f32.vlgmr.msra.gmra.mxu1 %vm277_vm2, %v676_v47 }
 0x436   :  { %v677_v50 = vmul.f32 %v1648_v57, %v669_v36  ;;  %v663_v51 = vsub.f32 2.0, %v655_v49 }
 0x437   :  { %v1670_v52 = vpop.eup %1669  ;;  %v662_v53 = vsub.f32 2.0, %v654_v44 }
 0x438   :  { %v1672_v55 = vpop.eup %1671  ;;  %v671_v56 = vmul.f32 %v1666_v46, %v663_v51  ;;  %v657_v58 = vmul.f32 %v1670_v52, %v639_v29  ;;  %1548 = vmatprep.mubr.msk.f32.mxu1 %vm277_vm2, %v677_v50 }
 0x439   :  { %v670_v54 = vmul.f32 %v1668_v48, %v662_v53  ;;  %v656_v61 = vmul.f32 %v1672_v55, %v636_v33 }
 0x43a   :  { %v679_v28 = vmul.f32 %v1941_v59, %v671_v56  ;;  %v665_v62 = vsub.f32 2.0, %v657_v58  ;;  %v51_v56 = vld [vmem:[#allocation5 + $0x60] sm:$0xff] }
 0x43b   :  { %v678_v25 = vmul.f32 %v1943_v60, %v670_v54  ;;  %v664_v7 = vsub.f32 2.0, %v656_v61 }
 0x43c   :  { %v1674_v8 = vpop.eup %1673  ;;  %v673_v27 = vmul.f32 %v1670_v52, %v665_v62  ;;  %v820_v52 = vlaneseq }
 0x43d   :  { %v672_v4 = vmul.f32 %v1672_v55, %v664_v7  ;;  %v658_v57 = vmul.f32 %v1674_v8, %v642_v40  ;;  %1549 = vmatmul.mubr.msk.f32.gmra.mxu1 %vm277_vm2, %v678_v25  ;;  %v39_v40 = vld [vmem:[#allocation5] sm:$0xff] }
 0x43e   :  { %v681_v22 = vmul.f32 %v1949_v63, %v673_v27  ;;  %1551 = vmatprep.mubr.msk.f32.mxu1 %vm277_vm2, %v679_v28  ;;  %v943_v63 = vpop.permute.xlu0 %942  ;;  %v821_v53 = vshrl.u32 %v820_v52, 7 }
 0x43f   :  { %v680_v23 = vmul.f32 %v1951_v1, %v672_v4  ;;  %v666_v34 = vsub.f32 2.0, %v658_v57  ;;  %v941_v1 = vpop.permute.xlu1 %940  ;;  %1577 = vmatpush3.msra.mxu1 %v943_v63  ;;  %v1764_v4 = vmov 1  }
 0x440   :  { %1578 = vmatprep.subr.mxu1 %v1755_v0  ;;  %v822_v55 = vsub.s32 0, %v821_v53  ;;  %1642 = vset.pattern.permute.xlu0 %v1764_v4 }
 0x441   :  { %v674_v24 = vmul.f32 %v1674_v8, %v666_v34  ;;  %1552 = vmatmul.mubr.msk.f32.gmra.mxu1 %vm277_vm2, %v680_v23 }
 0x442   :  { %1554 = vmatprep.mubr.msk.f32.mxu1 %vm277_vm2, %v681_v22  ;;  %1579 = vmatpush3.msra.mxu1 %v941_v1  ;;  %v937_v32 = vpop.permute.xlu0 %936  ;;  %v823_v58 = vrot.slane %v51_v56, %v822_v55 }
 0x443   :  { %v682_v59 = vmul.f32 %v1957_v2, %v674_v24  ;;  %v42_v2 = vld [vmem:[#allocation5 + $0x18] sm:$0xff]  ;;  %v939_v31 = vpop.permute.xlu1 %938  ;;  %1580 = vmatprep.subr.mxu1 %v1755_v0 }
 0x444   :  { %1581 = vmatpush3.msra.mxu1 %v939_v31 }
 0x445   :  { %1555 = vmatmul.mubr.msk.f32.gmra.mxu1 %vm277_vm2, %v682_v59  ;;  %1582 = vmatprep.subr.mxu1 %v1755_v0 }
 0x446   :  { %1608 = vmatprep.mubr.msk.f32.mxu1 %vm1756_vm0, %v1755_v0  ;;  %1583 = vmatpush3.msra.mxu1 %v937_v32  ;;  %v933_v39 = vpop.permute.xlu0 %932 }
 0x447   :  { %v935_v41 = vpop.permute.xlu1 %934  ;;  %1584 = vmatprep.subr.mxu1 %v1755_v0 }
 0x448   :  { %1585 = vmatpush3.msra.mxu1 %v935_v41 }
 0x449   :  { %1586 = vmatprep.subr.mxu1 %v1755_v0 }
 0x44a   :  { %1587 = vmatpush3.msra.mxu1 %v933_v39  ;;  %v929_v45 = vpop.permute.xlu0 %928 }
 0x44b   :  { %v931_v43 = vpop.permute.xlu1 %930  ;;  %1588 = vmatprep.subr.mxu1 %v1755_v0 }
 0x44c   :  { %1589 = vmatpush3.msra.mxu1 %v931_v43 }
 0x44d   :  { %1590 = vmatprep.subr.mxu1 %v1755_v0 }
 0x44e   :  { %1591 = vmatpush3.msra.mxu1 %v929_v45  ;;  %v925_v47 = vpop.permute.xlu0 %924 }
 0x44f   :  { %v927_v46 = vpop.permute.xlu1 %926  ;;  %1592 = vmatprep.subr.mxu1 %v1755_v0 }
 0x450   :  { %1593 = vmatpush3.msra.mxu1 %v927_v46 }
 0x451   :  { %1594 = vmatprep.subr.mxu1 %v1755_v0 }
 0x452   :  { %1595 = vmatpush3.msra.mxu1 %v925_v47  ;;  %v921_v36 = vpop.permute.xlu0 %920 }
 0x453   :  { %v923_v48 = vpop.permute.xlu1 %922  ;;  %1596 = vmatprep.subr.mxu1 %v1755_v0 }
 0x454   :  { %1597 = vmatpush3.msra.mxu1 %v923_v48 }
 0x455   :  { %1598 = vmatprep.subr.mxu1 %v1755_v0 }
 0x456   :  { %1599 = vmatpush3.msra.mxu1 %v921_v36  ;;  %v917_v44 = vpop.permute.xlu0 %916 }
 0x457   :  { %v919_v49 = vpop.permute.xlu1 %918  ;;  %1600 = vmatprep.subr.mxu1 %v1755_v0 }
 0x458   :  { %1601 = vmatpush3.msra.mxu1 %v919_v49 }
 0x459   :  { %1602 = vmatprep.subr.mxu1 %v1755_v0 }
 0x45a   :  { %1603 = vmatpush3.msra.mxu1 %v917_v44  ;;  %v913_v51 = vpop.permute.xlu0 %912 }
 0x45b   :  { %v915_v50 = vpop.permute.xlu1 %914  ;;  %1604 = vmatprep.subr.mxu1 %v1755_v0 }
 0x45c   :  { %1605 = vmatpush3.msra.mxu1 %v915_v50 }
 0x45d   :  { %1606 = vmatprep.subr.mxu1 %v1755_v0 }
 0x45e   :  { %1607 = vmatpush3.msra.mxu1 %v913_v51 }
 0x45f   :  { %v1031_v25 = vpop.permute.xlu1 %1030 }
 0x4f5   :  { %v1547_v3 = vpop.f32.mrf.mxu1 }
 0x4f6   :  { %v813_v38 = vmul.f32 %v1547_v3, %v40_v35 }
 0x4f7   :  { %v773_v5 = vpop.f32.mrf.mxu1 }
 0x4f8   :  { %v812_v42 = vmul.f32 %v773_v5, %v39_v40  ;;  %v68_v40 = vld [vmem:[#allocation5 + $0xe8] sm:$0xff] }
 0x4fd   :  { %v1550_v6 = vpop.f32.mrf.mxu1 }
 0x4fe   :  { %v815_v33 = vmul.f32 %v1550_v6, %v42_v2 }
 0x4ff   :  { %v783_v9 = vpop.f32.mrf.mxu1 }
 0x500   :  { %v814_v37 = vmul.f32 %v783_v9, %v41_v30 }
 0x501   :  { %v1553_v10 = vpop.f32.mrf.mxu1 }
 0x502   :  { %v817_v20 = vmul.f32 %v1553_v10, %v44_v17  ;;  %v1172_v17 = vrot.slane %v1857_v21, %v822_v55 }
 0x503   :  { %v793_v11 = vpop.f32.mrf.mxu1 }
 0x504   :  { %v816_v29 = vmul.f32 %v793_v11, %v43_v19 }
 0x505   :  { %v1556_v13 = vpop.f32.mrf.mxu1 }
 0x506   :  { %v819_v15 = vmul.f32 %v1556_v13, %v46_v12 }
 0x507   :  { %v803_v60 = vpop.f32.mrf.mxu1 }
 0x508   :  { %v818_v18 = vmul.f32 %v803_v60, %v45_v14  ;;  %1558 = vmatpush3.msra.mxu0 %v819_v15 }
 0x509   :  { %1559 = vmatprep.subr.mxu0 %v1755_v0 }
 0x50a   :  { %1560 = vmatpush3.msra.mxu0 %v818_v18 }
 0x50b   :  { %1561 = vmatprep.subr.mxu0 %v1755_v0 }
 0x50c   :  { %1562 = vmatpush3.msra.mxu0 %v817_v20 }
 0x50d   :  { %1563 = vmatprep.subr.mxu0 %v1755_v0 }
 0x50e   :  { %1564 = vmatpush3.msra.mxu0 %v816_v29 }
 0x50f   :  { %1565 = vmatprep.subr.mxu0 %v1755_v0 }
 0x510   :  { %1566 = vmatpush3.msra.mxu0 %v815_v33 }
 0x511   :  { %1567 = vmatprep.subr.mxu0 %v1755_v0 }
 0x512   :  { %1568 = vmatpush3.msra.mxu0 %v814_v37 }
 0x513   :  { %1569 = vmatprep.subr.mxu0 %v1755_v0 }
 0x514   :  { %1570 = vmatpush3.msra.mxu0 %v813_v38 }
 0x515   :  { %1571 = vmatprep.subr.mxu0 %v1755_v0 }
 0x516   :  { %1572 = vmatpush3.msra.mxu0 %v812_v42 }
 0x517   :  { %1574 = vmatmul.mubr.msk.f32.vlgmr.msra.gmra.mxu0 %vm826_vm11, %v825_v16  ;;  %1611 = vmatprep.subr.mxu0 %v1755_v0 }
 0x518   :  { %1613 = vmatprep.mubr.msk.f32.mxu0 %vm1756_vm0, %v1755_v0  ;;  %1612 = vmatpush3.msk.msra.mxu0 %vm1036_vm12, %v1031_v25 }
 0x519   :  { %1616 = vmatprep.subr.mxu0 %v1755_v0 }
 0x5d7   :  { %v895_v54 = vpop.f32.mrf.mxu0 }
 0x5d8   :  { %v896_v61 = vadd.f32 %v895_v54, %v823_v58 }
 0x5d9   :  { %v1575_v28 = vpop.f32.mrf.mxu0 }
 0x5da   :  { %v900_v62 = vmul.f32 1.442695, %v896_v61  ;;  %vm899_vm13 = vcmp.gt.f32.partialorder %v896_v61, 0.0 }
 0x5dc   :  { %1675 = vpow2.f32 %v900_v62 }
 0x5e9   :  { %v1676_v7 = vpop.eup %1675 }
 0x5ea   :  { %v1382_v8 = vadd.f32 -1.0, %v1676_v7 }
 0x5ec   :  { %v903_v27 = vsel %vm899_vm13, %v896_v61, %v1382_v8 }
 0x5ed   :  { %1609 = vmatmul.mubr.f32.vlgmr.msra.gmra.mxu1 %v903_v27 }
 0x6ad   :  { %v1026_v57 = vpop.f32.mrf.mxu1 }
 0x6ae   :  { %1614 = vmatmul.mubr.msk.f32.vlgmr.msra.gmra.mxu0 %vm1032_vm14, %v1026_v57 }
 0x6af   :  { %1617 = vmatpush3.msra.mxu0 %v1026_v57  ;;  %v1610_v22 = vpop.f32.mrf.mxu1  ;;  %1618 = vmatprep.mubr.msk.f32.mxu0 %vm1756_vm0, %v1755_v0 }
 0x6b0   :  { %1621 = vmatprep.subr.mxu0 %v1755_v0 }
 0x76e   :  { %v1105_v23 = vpop.f32.mrf.mxu0 }
 0x76f   :  { %1109 = vxpose.xlu1.b32.start.end [1/1] (short) (narrow) %v1105_v23, 8  ;;  %1143 = vperm.xlu0 %1642, %v1105_v23  }
 0x770   :  { %v1615_v34 = vpop.f32.mrf.mxu0 }
 0x78d   :  { %1174 = vrot.lane.b32.xlu1 %v1172_v17, %s1765_s25 }
 0x7ea   :  { %v1144_v3 = vpop.permute.xlu0 %1143 }
 0x7eb   :  { %v1125_v24 = vpop.trf.xlu1 }
 0x7ec   :  { %v1149_v59 = vrot.slane %v1125_v24, %v822_v55 }
 0x7ee   :  { %v1150_v5 = vadd.f32 %v1149_v59, %v1144_v3 }
 0x7f0   :  { %v1152_v6 = vmul.f32 0.2, %v1150_v5  ;;  %vm1151_vm15 = vcmp.gt.f32.partialorder %v1150_v5, 0.0 }
 0x7f2   :  { %v1153_v9 = vsel %vm1151_vm15, %v1150_v5, %v1152_v6 }
 0x7f3   :  { %v1154_v10 = vadd.f32 %v1153_v9, %v1871_v26 }
 0x7f5   :  { %v1155_v11 = vsel %vm277_vm2, %v1154_v10, -inf }
 0x7f6   :  { %1156 = vmax.xlane.f32.xlu0 %v1155_v11 }
 0x7ff   :  { %v1175_v1 = vpop.permute.xlu1 %1174 }
 0x87f   :  { %v1157_v12 = vpop.xlane.xlu0 %1156 }
 0x880   :  { %v1158_v13 = vsub.f32 %v1154_v10, %v1157_v12 }
 0x882   :  { %v1159_v14 = vmul.f32 1.442695, %v1158_v13 }
 0x884   :  { %1677 = vpow2.f32 %v1159_v14 }
 0x891   :  { %v1678_v15 = vpop.eup %1677 }
 0x892   :  { %v1161_v16 = vsel %vm277_vm2, %v1678_v15, 0.0 }
 0x893   :  { %1162 = vadd.xlane.f32.xlu0 %v1161_v16 }
 0x91c   :  { %v1163_v60 = vpop.xlane.xlu0 %1162 }
 0x91d   :  { %1679 = vrcp.f32 %v1163_v60 }
 0x92a   :  { %v1680_v18 = vpop.eup %1679 }
 0x92b   :  { %v1165_v19 = vmul.f32 %v1680_v18, %v1163_v60 }
 0x92d   :  { %v1166_v26 = vsub.f32 2.0, %v1165_v19 }
 0x92f   :  { %v1167_v20 = vmul.f32 %v1680_v18, %v1166_v26 }
 0x931   :  { %v1168_v63 = vmul.f32 %v1678_v15, %v1167_v20 }
 0x933   :  { %1619 = vmatmul.mubr.msk.f32.vlgmr.msra.gmra.mxu0 %vm277_vm2, %v1168_v63 }
 0x934   :  { %1623 = vmatprep.mubr.msk.f32.mxu0 %vm1756_vm0, %v1755_v0  ;;  %1622 = vmatpush3.msk.msra.mxu0 %vm1036_vm12, %v68_v40 }
 0x9f3   :  { %v1246_v2 = vpop.f32.mrf.mxu0 }
 0x9f4   :  { %v1247_v29 = vadd.f32 %v1246_v2, %v1175_v1 }
 0x9f5   :  { %v1620_v30 = vpop.f32.mrf.mxu0 }
 0x9f6   :  { %v1250_v21 = vsel %vm1032_vm14, %v1247_v29, -inf }
 0x9f7   :  { %1251 = vmax.xlane.f32.xlu0 %v1250_v21 }
 0xa80   :  { %v1252_v33 = vpop.xlane.xlu0 %1251 }
 0xa81   :  { %v1253_v31 = vsub.f32 %v1247_v29, %v1252_v33 }
 0xa83   :  { %v1254_v32 = vmul.f32 1.442695, %v1253_v31 }
 0xa85   :  { %1681 = vpow2.f32 %v1254_v32 }
 0xa92   :  { %v1682_v35 = vpop.eup %1681 }
 0xa93   :  { %v1256_v37 = vsel %vm1032_vm14, %v1682_v35, 0.0 }
 0xa94   :  { %1257 = vadd.xlane.f32.xlu0 %v1256_v37 }
 0xb1d   :  { %v1258_v38 = vpop.xlane.xlu0 %1257 }
 0xb1e   :  { %1683 = vlog2.f32 %v1258_v38 }
 0xb2b   :  { %v1684_v0 = vpop.eup %1683 }
 0xb2c   :  { %v1260_v41 = vmul.f32 0.6931472, %v1684_v0 }
 0xb2e   :  { %v1261_v42 = vsub.f32 %v1253_v31, %v1260_v41 }
 0xb30   :  { %1624 = vmatmul.mubr.msk.f32.vlgmr.msra.gmra.mxu0 %vm1032_vm14, %v1261_v42 }
 0xbf0   :  { %v1334_v39 = vpop.f32.mrf.mxu0 }
 0xbf1   :  { %1338 = vst [vmem:[#allocation7] sm:$0xff] %v1334_v39 }
 0xbf2   :  { %v1625_v43 = vpop.f32.mrf.mxu0 }
 0xbf3   :  { %1736 = shalt.err (!%p1733_p0)
}
 0xbf4   :  { %1348 = dma.vmem_to_hbm [thread:$0]  %s1346_s27, 128, %s2041_s2, [#allocation4]  }
 0xbf5   :  { %1749 = dma.done.wait [#allocation4], 128  }
 0xbf6   :  { %1750 = vsyncadd [#allocation4], 4294967168 }
 0xbf7   :  { %1352 = vsyncpa [#allocation3], 1 }
 0xbf8   :  { %1353 = vsyncpa [#allocation6], 1 }
 0xbf9   :  { %1354 = vsyncpa [#allocation4], 1 }

</bundles_post_ra>
